<compile_context>
chip_gen: v6e
topology: v6e:2x2x1
jax: 0.10.0
libtpu: 0.0.40
codegen_flags: <defaults>
</compile_context>

<pallas_src>
import numpy as np
import jax
import jax.numpy as jnp
from jax import lax
from jax.experimental import pallas as pl
from jax.experimental.pallas import tpu as pltpu

# ----- module hyperparameters (WaveletLayer defaults used in forward) -----
IN_CHANNELS = 4
HIDDEN_CHANNELS = 8
OUT_CHANNELS = IN_CHANNELS          # out_channels defaults to in_channels
WAVELET_K = 13                      # conv_in kernel size, padding='same'
OUT_CONV_K = 8                      # conv_out kernel size, padding = 4
SCALE = 2
N_POINTS = 10
FOLD = N_POINTS // SCALE            # 5
SPACE = np.linspace(-5.0, 5.0, N_POINTS)
N_SLABS = OUT_CONV_K + 1            # 5 A-shifts + 4 O-shifts in the fused conv_out
assert N_POINTS % 2 == 0            # symmetry of SPACE is exploited in the kernel

# SPACE[s]^2 = (25/81) * {81, 49, 25, 9, 1} for s = 0..4  ->  one exp, integer powers.
_BASE_Q = 25.0 / 81.0
_COS = {int(round(float(SPACE[s]) ** 2 / _BASE_Q)): float(np.cos(float(SPACE[s])))
        for s in range(FOLD)}
assert sorted(_COS) == [1, 9, 25, 49, 81]


def _round_up(n, m):
    return ((n + m - 1) // m) * m


def _pick_batch_block(B, L, Cp, H, Cout):
    """Batch elements packed per grid step (lane-batched), VMEM-budget aware."""
    P = L + 17
    per_elem = P * (2 * Cp * 4                  # x tile (double-buffered)
                    + WAVELET_K * Cp * 4        # im2col slab (f32)
                    + 14 * H * 4                # h/|h|/exp powers/A/O (f32)
                    + 2 * N_SLABS * H * 2       # bf16 ext slabs + concatenated S
                    + 2 * 2 * Cout * 4)         # output tile (double-buffered)
    budget = 20 << 20                           # well inside every generation's VMEM
    bb_max = max(1, min(B, budget // max(per_elem, 1)))
    bb = 1
    for cand in range(int(bb_max), 0, -1):      # largest divisor of B under budget
        if B % cand == 0:
            bb = cand
            break
    # v7x has two TensorCores: keep >= 2 "parallel" grid steps when the batch allows.
    try:
        kind = jax.devices()[0].device_kind.lower()
    except Exception:
        kind = ""
    if ("v7" in kind or "7x" in kind) and B // bb < 2 and B >= 2:
        for cand in range(B // 2, 0, -1):
            if B % cand == 0:
                bb = cand
                break
    return bb


def wavelet_kernel(x_ref, mA_ref, mO_ref, win_ref, bin_ref, wout_ref, bout_ref, o_ref):
    Wn = o_ref.shape[-1]           # BB * P lanes (all batch elements of this grid step)
    H = bin_ref.shape[0]

    xp = x_ref[0]                  # (Cp, Wn + 12), channels on sublanes, lanes = BB*P

    # ---- conv_in (k=13, 'same') as ONE im2col matmul for the whole lane-batched slab.
    # xs row (k*Cp + c), col g  ==  x_pad[c, g + k]; every tap shift is a static lane slice.
    xs = jnp.concatenate([xp[:, k:k + Wn] for k in range(WAVELET_K)], axis=0)
    h = jnp.dot(win_ref[...], xs,
                precision=lax.Precision.HIGHEST,
                preferred_element_type=jnp.float32) + bin_ref[...]          # (H, Wn)

    # ---- wavelet nonlinearity.  Half-sum A of the fold (the two halves are equal by
    # symmetry of SPACE); only ONE exp per element, other terms are powers of E0.
    ax = jnp.abs(h)
    e1 = jnp.exp((-_BASE_Q) * ax)           # E0 = exp(-(25/81)*|h|)
    e2 = e1 * e1
    e4 = e2 * e2
    e8 = e4 * e4
    e16 = e8 * e8
    e32 = e16 * e16
    e9 = e8 * e1                            # E0^9
    e25 = e16 * e9                          # E0^25
    e49 = e32 * e16 * e1                    # E0^49
    e81 = e49 * e32                         # E0^81
    A = (_COS[1] * e1 + _COS[9] * e9 + _COS[25] * e25
         + _COS[49] * e49 + _COS[81] * e81)                                  # (H, Wn)

    # zero A outside the true per-element sequence range (precomputed lane mask)
    A = A * mA_ref[...]

    # folded odd entries O[l] = A[l] + A[l+1] (valid l in [0, L-2], via mask)
    zA = jnp.zeros((H, 2), jnp.float32)
    A_ext = jnp.concatenate([zA, A, zA], axis=1)                             # (H, Wn+4)
    O = (A_ext[:, 2:2 + Wn] + A_ext[:, 3:3 + Wn]) * mO_ref[...]              # (H, Wn)

    # ---- conv_out (k=8, pad 4) as ONE matmul over 9 lane-shifted bf16 slabs:
    # slabs 0..4 = A shifted by d = -2..+2 (factor 2 of the even entries is folded into
    # the weights), slabs 5..8 = O shifted by d = -2..+1.
    A_bf = A_ext.astype(jnp.bfloat16)                                        # (H, Wn+4)
    zO = jnp.zeros((H, 2), jnp.bfloat16)
    O_bf = jnp.concatenate([zO, O.astype(jnp.bfloat16), zO], axis=1)         # (H, Wn+4)

    slabs = [A_bf[:, 2 + d: 2 + d + Wn] for d in range(-2, 3)] + \
            [O_bf[:, 2 + d: 2 + d + Wn] for d in range(-2, 2)]
    S = jnp.concatenate(slabs, axis=0)                                       # (9*H, Wn)

    out = jnp.dot(wout_ref[...], S, preferred_element_type=jnp.float32)      # (2*Cout, Wn)
    # rows 0..Cout-1: even output positions 2m, rows Cout..2Cout-1: odd (2m+1)
    o_ref[0] = out + bout_ref[...]


def wavelet_layer_pallas(x, w_in_t, b_in, w_out_t, b_out):
    """x: (B, C_in, L) NCL; weights in PyTorch layout (O, I, K). Returns (B, C_out, 2L)."""
    B, Cin, L = x.shape
    H = w_in_t.shape[0]
    Cout = w_out_t.shape[0]
    Cp = _round_up(Cin, 8)                 # pad input channels to a full sublane group
    P = L + 17                             # per-element lane stride: 8 left + L + 9 right
    BB = _pick_batch_block(B, L, Cp, H, Cout)
    NB = B // BB
    W = BB * P

    # ---- input: keep NCL; zero-pad channels (-> Cp) and length (8 left / 9 right per
    # element so all 13 tap shifts of the extended window stay inside the element).
    x_pad = jnp.pad(x.astype(jnp.float32), ((0, 0), (0, Cp - Cin), (8, 9)))  # (B, Cp, P)
    # lane-batch BB elements per grid step, plus 12 trailing zero lanes so every tap
    # slice of width W is in bounds for the last element.
    x_grp = x_pad.reshape(NB, BB, Cp, P).transpose(0, 2, 1, 3).reshape(NB, Cp, W)
    x_grp = jnp.pad(x_grp, ((0, 0), (0, 0), (0, 12)))                        # (NB, Cp, W+12)

    # ---- per-element column masks (q = lane % P; sequence index i = q - 2):
    # A valid for q in [2, L+1]  (i in [0, L-1]);  O valid for q in [2, L]  (l in [0, L-2]).
    q = jnp.arange(W, dtype=jnp.int32) % P
    mA = ((q >= 2) & (q <= L + 1)).astype(jnp.float32)[None, :]              # (1, W)
    mO = ((q >= 2) & (q <= L)).astype(jnp.float32)[None, :]                  # (1, W)

    # ---- conv_in weights flattened for the im2col matmul:
    # win_flat[h, k*Cp + c] = w_in[h, c, k]  (zeros in the padded channel rows).
    w_in_p = jnp.pad(w_in_t.astype(jnp.float32), ((0, 0), (0, Cp - Cin), (0, 0)))
    win_flat = jnp.transpose(w_in_p, (0, 2, 1)).reshape(H, WAVELET_K * Cp)
    b_in2 = b_in.reshape(H, 1).astype(jnp.float32)

    # ---- conv_out weights arranged for the fused parity matmul (2*Cout, 9*H).
    # even positions 2m:  sum_j 2*W[:,:,2j]*A[m+j-2] + W[:,:,2j+1]*O[m+j-2]
    # odd  positions 2m+1: sum_j 2*W[:,:,2j+1]*A[m+j-1] + W[:,:,2j]*O[m+j-2]
    Wt = w_out_t.astype(jnp.float32)       # (Cout, H, 8)
    zb = jnp.zeros((Cout, H), jnp.float32)
    w_even = jnp.concatenate(
        [2.0 * Wt[:, :, 0], 2.0 * Wt[:, :, 2], 2.0 * Wt[:, :, 4], 2.0 * Wt[:, :, 6], zb,
         Wt[:, :, 1], Wt[:, :, 3], Wt[:, :, 5], Wt[:, :, 7]], axis=1)
    w_odd = jnp.concatenate(
        [zb, 2.0 * Wt[:, :, 1], 2.0 * Wt[:, :, 3], 2.0 * Wt[:, :, 5], 2.0 * Wt[:, :, 7],
         Wt[:, :, 0], Wt[:, :, 2], Wt[:, :, 4], Wt[:, :, 6]], axis=1)
    wout_full = jnp.concatenate([w_even, w_odd], axis=0).astype(jnp.bfloat16)
    b_out2 = jnp.concatenate([b_out, b_out]).reshape(2 * Cout, 1).astype(jnp.float32)

    out = pl.pallas_call(
        wavelet_kernel,
        out_shape=jax.ShapeDtypeStruct((NB, 2 * Cout, W), jnp.float32),
        grid_spec=pltpu.PrefetchScalarGridSpec(
            num_scalar_prefetch=0,
            grid=(NB,),
            in_specs=[
                pl.BlockSpec((1, Cp, W + 12), lambda b: (b, 0, 0)),
                pl.BlockSpec((1, W), lambda b: (0, 0)),
                pl.BlockSpec((1, W), lambda b: (0, 0)),
                pl.BlockSpec((H, WAVELET_K * Cp), lambda b: (0, 0)),
                pl.BlockSpec((H, 1), lambda b: (0, 0)),
                pl.BlockSpec((2 * Cout, N_SLABS * H), lambda b: (0, 0)),
                pl.BlockSpec((2 * Cout, 1), lambda b: (0, 0)),
            ],
            out_specs=pl.BlockSpec((1, 2 * Cout, W), lambda b: (b, 0, 0)),
        ),
        compiler_params=pltpu.CompilerParams(
            dimension_semantics=("parallel",),
            vmem_limit_bytes=32 << 20,
        ),
    )(x_grp, mA, mO, win_flat, b_in2, wout_full, b_out2)

    # unpack lanes: (NB, 2*Cout, BB*P) -> per-element cols q in [2, L+1] -> (B, 2*Cout, L)
    out = out.reshape(NB, 2 * Cout, BB, P)[..., 2:2 + L]
    out = out.transpose(0, 2, 1, 3).reshape(B, 2 * Cout, L)
    # interleave even/odd output positions: (B, 2*Cout, L) -> (B, Cout, 2L)
    out = out.reshape(B, 2, Cout, L).transpose(0, 2, 3, 1).reshape(B, Cout, 2 * L)
    return out


def wavelet_reference(x, w_in_t, b_in, w_out_t, b_out):
    """Pure-JAX reference of the PyTorch forward (NCL layout)."""
    pad_in = WAVELET_K // 2
    h = lax.conv_general_dilated(x, w_in_t, (1,), [(pad_in, pad_in)],
                                 dimension_numbers=("NCH", "OIH", "NCH"),
                                 precision=lax.Precision.HIGHEST)
    h = h + b_in[None, :, None]
    space = jnp.asarray(SPACE, jnp.float32)
    y = jnp.cos(space)[None, None, None, :] * jnp.exp(
        -(space ** 2)[None, None, None, :] * jnp.abs(h)[..., None])     # (B,H,L,10)
    B, H, L = h.shape
    yf = y.reshape(B, H, L * N_POINTS)
    nwin = (L * N_POINTS - N_POINTS) // FOLD + 1                        # 2L-1
    idx = jnp.arange(nwin)[:, None] * FOLD + jnp.arange(N_POINTS)[None, :]
    z = yf[:, :, idx].sum(-1)                                           # (B,H,2L-1)
    pad_out = OUT_CONV_K // 2
    out = lax.conv_general_dilated(z, w_out_t, (1,), [(pad_out, pad_out)],
                                   dimension_numbers=("NCH", "OIH", "NCH"),
                                   precision=lax.Precision.HIGHEST)
    return out + b_out[None, :, None]


if __name__ == "__main__":
    key = jax.random.PRNGKey(0)
    kx, k1, k2, k3, k4 = jax.random.split(key, 5)
    B, L = 2, 16

    x = jax.random.normal(kx, (B, IN_CHANNELS, L), jnp.float32)

    # Deterministic PyTorch-style init: U(-1/sqrt(fan_in), 1/sqrt(fan_in))
    fan1 = IN_CHANNELS * WAVELET_K
    fan2 = HIDDEN_CHANNELS * OUT_CONV_K
    w_in_t = jax.random.uniform(k1, (HIDDEN_CHANNELS, IN_CHANNELS, WAVELET_K),
                                jnp.float32, -1.0 / np.sqrt(fan1), 1.0 / np.sqrt(fan1))
    b_in = jax.random.uniform(k2, (HIDDEN_CHANNELS,),
                              jnp.float32, -1.0 / np.sqrt(fan1), 1.0 / np.sqrt(fan1))
    w_out_t = jax.random.uniform(k3, (OUT_CHANNELS, HIDDEN_CHANNELS, OUT_CONV_K),
                                 jnp.float32, -1.0 / np.sqrt(fan2), 1.0 / np.sqrt(fan2))
    b_out = jax.random.uniform(k4, (OUT_CHANNELS,),
                               jnp.float32, -1.0 / np.sqrt(fan2), 1.0 / np.sqrt(fan2))

    out = wavelet_layer_pallas(x, w_in_t, b_in, w_out_t, b_out)
    out = jax.block_until_ready(out)

    ref = wavelet_reference(x, w_in_t, b_in, w_out_t, b_out)
    assert out.shape == ref.shape == (B, OUT_CHANNELS, 2 * L)
    # conv_out runs with bf16 MXU inputs (f32 accumulation) -> slightly looser tolerance.
    np.testing.assert_allclose(np.asarray(out), np.asarray(ref), rtol=2e-2, atol=2e-2)
    print("KERNEL_OK")
</pallas_src>

<mosaic_0001>
module attributes {stable_mosaic.version = 11 : i64} {
  func.func @wavelet_kernel(%arg0: i32, %arg1: memref<1x8x78xf32, #tpu.memory_space<vmem>>, %arg2: memref<1x66xf32, #tpu.memory_space<vmem>>, %arg3: memref<1x66xf32, #tpu.memory_space<vmem>>, %arg4: memref<8x104xf32, #tpu.memory_space<vmem>>, %arg5: memref<8x1xf32, #tpu.memory_space<vmem>>, %arg6: memref<8x72xbf16, #tpu.memory_space<vmem>>, %arg7: memref<8x1xf32, #tpu.memory_space<vmem>>, %arg8: memref<1x8x66xf32, #tpu.memory_space<vmem>>) attributes {dimension_semantics = [#tpu.dimension_semantics<parallel>], iteration_bounds = array<i64: 1>, scalar_prefetch = 0 : i64, scratch_operands = 0 : i64, tpu.core_type = #tpu.core_type<tc>, window_params = [{transform_indices = @transform_0, window_bounds = array<i64: 1, 8, 78>}, {pipeline_mode = #tpu.pipeline_mode<synchronous>, transform_indices = @transform_1, window_bounds = array<i64: 1, 66>}, {pipeline_mode = #tpu.pipeline_mode<synchronous>, transform_indices = @transform_2, window_bounds = array<i64: 1, 66>}, {pipeline_mode = #tpu.pipeline_mode<synchronous>, transform_indices = @transform_3, window_bounds = array<i64: 8, 104>}, {pipeline_mode = #tpu.pipeline_mode<synchronous>, transform_indices = @transform_4, window_bounds = array<i64: 8, 1>}, {pipeline_mode = #tpu.pipeline_mode<synchronous>, transform_indices = @transform_5, window_bounds = array<i64: 8, 72>}, {pipeline_mode = #tpu.pipeline_mode<synchronous>, transform_indices = @transform_6, window_bounds = array<i64: 8, 1>}, {transform_indices = @transform_7, window_bounds = array<i64: 1, 8, 66>}]} {
    %c0 = arith.constant 0 : index
    %c0_0 = arith.constant 0 : index
    %c0_1 = arith.constant 0 : index
    %0 = vector.load %arg1[%c0, %c0_0, %c0_1] : memref<1x8x78xf32, #tpu.memory_space<vmem>>, vector<1x8x78xf32>
    %1 = vector.shape_cast %0 : vector<1x8x78xf32> to vector<8x78xf32>
    %2 = vector.extract_strided_slice %1 {offsets = [0, 0], sizes = [8, 66], strides = [1, 1]} : vector<8x78xf32> to vector<8x66xf32>
    %3 = vector.extract_strided_slice %1 {offsets = [0, 1], sizes = [8, 66], strides = [1, 1]} : vector<8x78xf32> to vector<8x66xf32>
    %4 = vector.extract_strided_slice %1 {offsets = [0, 2], sizes = [8, 66], strides = [1, 1]} : vector<8x78xf32> to vector<8x66xf32>
    %5 = vector.extract_strided_slice %1 {offsets = [0, 3], sizes = [8, 66], strides = [1, 1]} : vector<8x78xf32> to vector<8x66xf32>
    %6 = vector.extract_strided_slice %1 {offsets = [0, 4], sizes = [8, 66], strides = [1, 1]} : vector<8x78xf32> to vector<8x66xf32>
    %7 = vector.extract_strided_slice %1 {offsets = [0, 5], sizes = [8, 66], strides = [1, 1]} : vector<8x78xf32> to vector<8x66xf32>
    %8 = vector.extract_strided_slice %1 {offsets = [0, 6], sizes = [8, 66], strides = [1, 1]} : vector<8x78xf32> to vector<8x66xf32>
    %9 = vector.extract_strided_slice %1 {offsets = [0, 7], sizes = [8, 66], strides = [1, 1]} : vector<8x78xf32> to vector<8x66xf32>
    %10 = vector.extract_strided_slice %1 {offsets = [0, 8], sizes = [8, 66], strides = [1, 1]} : vector<8x78xf32> to vector<8x66xf32>
    %11 = vector.extract_strided_slice %1 {offsets = [0, 9], sizes = [8, 66], strides = [1, 1]} : vector<8x78xf32> to vector<8x66xf32>
    %12 = vector.extract_strided_slice %1 {offsets = [0, 10], sizes = [8, 66], strides = [1, 1]} : vector<8x78xf32> to vector<8x66xf32>
    %13 = vector.extract_strided_slice %1 {offsets = [0, 11], sizes = [8, 66], strides = [1, 1]} : vector<8x78xf32> to vector<8x66xf32>
    %14 = vector.extract_strided_slice %1 {offsets = [0, 12], sizes = [8, 66], strides = [1, 1]} : vector<8x78xf32> to vector<8x66xf32>
    %15 = tpu.concatenate %2, %3, %4, %5, %6, %7, %8, %9, %10, %11, %12, %13, %14 in 0 : vector<8x66xf32>, vector<8x66xf32>, vector<8x66xf32>, vector<8x66xf32>, vector<8x66xf32>, vector<8x66xf32>, vector<8x66xf32>, vector<8x66xf32>, vector<8x66xf32>, vector<8x66xf32>, vector<8x66xf32>, vector<8x66xf32>, vector<8x66xf32> -> vector<104x66xf32>
    %c0_2 = arith.constant 0 : index
    %c0_3 = arith.constant 0 : index
    %16 = vector.load %arg4[%c0_2, %c0_3] : memref<8x104xf32, #tpu.memory_space<vmem>>, vector<8x104xf32>
    %cst = arith.constant dense<0.000000e+00> : vector<8x66xf32>
    %17 = tpu.matmul %16, %15, %cst {dimension_numbers = #tpu.dot_dimension_numbers<[1], [0], [0], [1], [0, 0, 1, 1], [], []>, precision = #tpu.contract_precision<fp32>} : vector<8x104xf32>, vector<104x66xf32>, vector<8x66xf32> -> vector<8x66xf32>
    %c0_4 = arith.constant 0 : index
    %c0_5 = arith.constant 0 : index
    %18 = vector.load %arg5[%c0_4, %c0_5] : memref<8x1xf32, #tpu.memory_space<vmem>>, vector<8x1xf32>
    %19 = vector.broadcast %18 : vector<8x1xf32> to vector<8x66xf32>
    %20 = arith.addf %17, %19 : vector<8x66xf32>
    %21 = math.absf %20 : vector<8x66xf32>
    %cst_6 = arith.constant -0.30864197 : f32
    %22 = vector.broadcast %cst_6 : f32 to vector<8x66xf32>
    %23 = arith.mulf %22, %21 : vector<8x66xf32>
    %24 = math.exp %23 : vector<8x66xf32>
    %25 = arith.mulf %24, %24 : vector<8x66xf32>
    %26 = arith.mulf %25, %25 : vector<8x66xf32>
    %27 = arith.mulf %26, %26 : vector<8x66xf32>
    %28 = arith.mulf %27, %27 : vector<8x66xf32>
    %29 = arith.mulf %28, %28 : vector<8x66xf32>
    %30 = arith.mulf %27, %24 : vector<8x66xf32>
    %31 = arith.mulf %28, %30 : vector<8x66xf32>
    %32 = arith.mulf %29, %28 : vector<8x66xf32>
    %33 = arith.mulf %32, %24 : vector<8x66xf32>
    %34 = arith.mulf %33, %29 : vector<8x66xf32>
    %cst_7 = arith.constant 0.849607586 : f32
    %35 = vector.broadcast %cst_7 : f32 to vector<8x66xf32>
    %36 = arith.mulf %35, %24 : vector<8x66xf32>
    %cst_8 = arith.constant -0.095723547 : f32
    %37 = vector.broadcast %cst_8 : f32 to vector<8x66xf32>
    %38 = arith.mulf %37, %30 : vector<8x66xf32>
    %39 = arith.addf %36, %38 : vector<8x66xf32>
    %cst_9 = arith.constant -0.934546113 : f32
    %40 = vector.broadcast %cst_9 : f32 to vector<8x66xf32>
    %41 = arith.mulf %40, %31 : vector<8x66xf32>
    %42 = arith.addf %39, %41 : vector<8x66xf32>
    %cst_10 = arith.constant -0.73352921 : f32
    %43 = vector.broadcast %cst_10 : f32 to vector<8x66xf32>
    %44 = arith.mulf %43, %33 : vector<8x66xf32>
    %45 = arith.addf %42, %44 : vector<8x66xf32>
    %cst_11 = arith.constant 0.2836622 : f32
    %46 = vector.broadcast %cst_11 : f32 to vector<8x66xf32>
    %47 = arith.mulf %46, %34 : vector<8x66xf32>
    %48 = arith.addf %45, %47 : vector<8x66xf32>
    %c0_12 = arith.constant 0 : index
    %c0_13 = arith.constant 0 : index
    %49 = vector.load %arg2[%c0_12, %c0_13] : memref<1x66xf32, #tpu.memory_space<vmem>>, vector<1x66xf32>
    %50 = vector.broadcast %49 : vector<1x66xf32> to vector<8x66xf32>
    %51 = arith.mulf %48, %50 : vector<8x66xf32>
    %cst_14 = arith.constant 0.000000e+00 : f32
    %52 = vector.broadcast %cst_14 : f32 to vector<8x2xf32>
    %53 = tpu.concatenate %52, %51, %52 in 1 : vector<8x2xf32>, vector<8x66xf32>, vector<8x2xf32> -> vector<8x70xf32>
    %54 = vector.extract_strided_slice %53 {offsets = [0, 2], sizes = [8, 66], strides = [1, 1]} : vector<8x70xf32> to vector<8x66xf32>
    %55 = vector.extract_strided_slice %53 {offsets = [0, 3], sizes = [8, 66], strides = [1, 1]} : vector<8x70xf32> to vector<8x66xf32>
    %56 = arith.addf %54, %55 : vector<8x66xf32>
    %c0_15 = arith.constant 0 : index
    %c0_16 = arith.constant 0 : index
    %57 = vector.load %arg3[%c0_15, %c0_16] : memref<1x66xf32, #tpu.memory_space<vmem>>, vector<1x66xf32>
    %58 = vector.broadcast %57 : vector<1x66xf32> to vector<8x66xf32>
    %59 = arith.mulf %56, %58 : vector<8x66xf32>
    %60 = arith.truncf %53 : vector<8x70xf32> to vector<8x70xbf16>
    %cst_17 = arith.constant 0.000000e+00 : bf16
    %61 = vector.broadcast %cst_17 : bf16 to vector<8x2xbf16>
    %62 = arith.truncf %59 : vector<8x66xf32> to vector<8x66xbf16>
    %63 = tpu.concatenate %61, %62, %61 in 1 : vector<8x2xbf16>, vector<8x66xbf16>, vector<8x2xbf16> -> vector<8x70xbf16>
    %64 = vector.extract_strided_slice %60 {offsets = [0, 0], sizes = [8, 66], strides = [1, 1]} : vector<8x70xbf16> to vector<8x66xbf16>
    %65 = vector.extract_strided_slice %60 {offsets = [0, 1], sizes = [8, 66], strides = [1, 1]} : vector<8x70xbf16> to vector<8x66xbf16>
    %66 = vector.extract_strided_slice %60 {offsets = [0, 2], sizes = [8, 66], strides = [1, 1]} : vector<8x70xbf16> to vector<8x66xbf16>
    %67 = vector.extract_strided_slice %60 {offsets = [0, 3], sizes = [8, 66], strides = [1, 1]} : vector<8x70xbf16> to vector<8x66xbf16>
    %68 = vector.extract_strided_slice %60 {offsets = [0, 4], sizes = [8, 66], strides = [1, 1]} : vector<8x70xbf16> to vector<8x66xbf16>
    %69 = vector.extract_strided_slice %63 {offsets = [0, 0], sizes = [8, 66], strides = [1, 1]} : vector<8x70xbf16> to vector<8x66xbf16>
    %70 = vector.extract_strided_slice %63 {offsets = [0, 1], sizes = [8, 66], strides = [1, 1]} : vector<8x70xbf16> to vector<8x66xbf16>
    %71 = vector.extract_strided_slice %63 {offsets = [0, 2], sizes = [8, 66], strides = [1, 1]} : vector<8x70xbf16> to vector<8x66xbf16>
    %72 = vector.extract_strided_slice %63 {offsets = [0, 3], sizes = [8, 66], strides = [1, 1]} : vector<8x70xbf16> to vector<8x66xbf16>
    %73 = tpu.concatenate %64, %65, %66, %67, %68, %69, %70, %71, %72 in 0 : vector<8x66xbf16>, vector<8x66xbf16>, vector<8x66xbf16>, vector<8x66xbf16>, vector<8x66xbf16>, vector<8x66xbf16>, vector<8x66xbf16>, vector<8x66xbf16>, vector<8x66xbf16> -> vector<72x66xbf16>
    %c0_18 = arith.constant 0 : index
    %c0_19 = arith.constant 0 : index
    %74 = vector.load %arg6[%c0_18, %c0_19] : memref<8x72xbf16, #tpu.memory_space<vmem>>, vector<8x72xbf16>
    %cst_20 = arith.constant dense<0.000000e+00> : vector<8x66xf32>
    %75 = tpu.matmul %74, %73, %cst_20 {dimension_numbers = #tpu.dot_dimension_numbers<[1], [0], [0], [1], [0, 0, 1, 1], [], []>} : vector<8x72xbf16>, vector<72x66xbf16>, vector<8x66xf32> -> vector<8x66xf32>
    %c0_21 = arith.constant 0 : index
    %c0_22 = arith.constant 0 : index
    %76 = vector.load %arg7[%c0_21, %c0_22] : memref<8x1xf32, #tpu.memory_space<vmem>>, vector<8x1xf32>
    %77 = vector.broadcast %76 : vector<8x1xf32> to vector<8x66xf32>
    %78 = arith.addf %75, %77 : vector<8x66xf32>
    %c0_23 = arith.constant 0 : index
    %c0_24 = arith.constant 0 : index
    %c0_25 = arith.constant 0 : index
    %79 = vector.load %arg8[%c0_23, %c0_24, %c0_25] : memref<1x8x66xf32, #tpu.memory_space<vmem>>, vector<1x8x66xf32>
    %80 = vector.shape_cast %79 : vector<1x8x66xf32> to vector<8x66xf32>
    %81 = vector.shape_cast %78 : vector<8x66xf32> to vector<1x8x66xf32>
    tpu.vector_store %arg8[%c0_23, %c0_24, %c0_25], %81 {strides = array<i32>} : memref<1x8x66xf32, #tpu.memory_space<vmem>>, vector<1x8x66xf32>,
    return
  }
  func.func @transform_0(%arg0: i32) -> (i32, i32, i32) {
    %c0_i32 = arith.constant 0 : i32
    %c0_i32_0 = arith.constant 0 : i32
    %c0_i32_1 = arith.constant 0 : i32
    return %arg0, %c0_i32, %c0_i32_0 : i32, i32, i32
  }
  func.func @transform_1(%arg0: i32) -> (i32, i32) {
    %c0_i32 = arith.constant 0 : i32
    %c0_i32_0 = arith.constant 0 : i32
    %c0_i32_1 = arith.constant 0 : i32
    return %c0_i32, %c0_i32_0 : i32, i32
  }
  func.func @transform_2(%arg0: i32) -> (i32, i32) {
    %c0_i32 = arith.constant 0 : i32
    %c0_i32_0 = arith.constant 0 : i32
    %c0_i32_1 = arith.constant 0 : i32
    return %c0_i32, %c0_i32_0 : i32, i32
  }
  func.func @transform_3(%arg0: i32) -> (i32, i32) {
    %c0_i32 = arith.constant 0 : i32
    %c0_i32_0 = arith.constant 0 : i32
    %c0_i32_1 = arith.constant 0 : i32
    return %c0_i32, %c0_i32_0 : i32, i32
  }
  func.func @transform_4(%arg0: i32) -> (i32, i32) {
    %c0_i32 = arith.constant 0 : i32
    %c0_i32_0 = arith.constant 0 : i32
    %c0_i32_1 = arith.constant 0 : i32
    return %c0_i32, %c0_i32_0 : i32, i32
  }
  func.func @transform_5(%arg0: i32) -> (i32, i32) {
    %c0_i32 = arith.constant 0 : i32
    %c0_i32_0 = arith.constant 0 : i32
    %c0_i32_1 = arith.constant 0 : i32
    return %c0_i32, %c0_i32_0 : i32, i32
  }
  func.func @transform_6(%arg0: i32) -> (i32, i32) {
    %c0_i32 = arith.constant 0 : i32
    %c0_i32_0 = arith.constant 0 : i32
    %c0_i32_1 = arith.constant 0 : i32
    return %c0_i32, %c0_i32_0 : i32, i32
  }
  func.func @transform_7(%arg0: i32) -> (i32, i32, i32) {
    %c0_i32 = arith.constant 0 : i32
    %c0_i32_0 = arith.constant 0 : i32
    %c0_i32_1 = arith.constant 0 : i32
    return %arg0, %c0_i32, %c0_i32_0 : i32, i32, i32
  }
}

</mosaic_0001>

<bundles_post_ra>
// kernel: tpu_custom_call.1
= control target key start
LH: loop header
LB: loop body
LE: loop exit
PB: predicated region body
PF: predicated region fallthrough
CT: control target
= control target key end

     0   :  { %12 = vsyncpa [#allocation3], 0  ;;  %s1662_s0 = inlined_call_operand.vmem [shape: f32[1,8,78], index: 0, kind: input, shape index: {}]   ;;  %s1663_s1 = inlined_call_operand.hbm [shape: f32[1,66], index: 1, kind: input, shape index: {}]   ;;  %s1664_s2 = inlined_call_operand.hbm [shape: f32[1,66], index: 2, kind: input, shape index: {}]   ;;  %s1665_s3 = inlined_call_operand.vmem [shape: f32[8,104], index: 3, kind: input, shape index: {}]   ;;  %s1666_s4 = inlined_call_operand.vmem [shape: f32[8,1], index: 4, kind: input, shape index: {}]   ;;  %s1667_s5 = inlined_call_operand.vmem [shape: bf16[8,72], index: 5, kind: input, shape index: {}]   ;;  %s1668_s6 = inlined_call_operand.vmem [shape: f32[8,1], index: 6, kind: input, shape index: {}]   ;;  %s1669_s7 = inlined_call_operand.hbm [shape: f32[1,8,66], index: 7, kind: output, shape index: {}]  }
   0x1   :  { %13 = vsyncpa [#allocation6], 0 }
   0x2   :  { %14 = vsyncpa [#allocation4], 0  ;;  %s1239_s24 = smov [#allocation2]   ;;  %s1240_s26 = smov [#allocation5]  }
   0x3   :  { %s23_s25 = sshll.u32 %s1239_s24, 4  ;;  %s33_s27 = sshll.u32 %s1240_s26, 4  ;;  %s24_s25 = int_to_ptr.vmem [resolvable:$true] %s23_s25  ;;  %s34_s27 = int_to_ptr.vmem [resolvable:$true] %s33_s27 }
   0x4   :  { %s1181_s28 = scalar_lea.vmem %s24_s25, 16  ;;  %s1185_s29 = scalar_lea.vmem %s24_s25, 32 }
   0x5   :  { %p1182_p0 = scmp.ne.s32.totalorder %s24_s25, %s1181_s28  ;;  %p1186_p1 = scmp.lt.s32.totalorder %s24_s25, %s24_s25 }
   0x6   :  { %p1187_p2 = scmp.lt.s32.totalorder %s1185_s29, %s1181_s28 }
   0x8   :  { %p1188_p3 = por %p1187_p2, %p1186_p1 }
   0xa   :  { %p1189_p4 = pnand %p1188_p3, %p1182_p0 }
   0xc   :  { %1192 = shalt.err (!%p1189_p4)
}
   0xd   :  { %26 = dma.hbm_to_vmem [thread:$0]  %s1663_s1, 16, %s24_s25, [#allocation3]  }
   0xe   :  { %s1201_s9 = scalar_lea.vmem %s34_s27, 16  ;;  %s1205_s10 = scalar_lea.vmem %s34_s27, 32 }
   0xf   :  { %p1202_p5 = scmp.ne.s32.totalorder %s34_s27, %s1201_s9  ;;  %p1206_p6 = scmp.lt.s32.totalorder %s34_s27, %s34_s27 }
  0x10   :  { %p1207_p7 = scmp.lt.s32.totalorder %s1205_s10, %s1201_s9 }
  0x12   :  { %p1208_p8 = por %p1207_p7, %p1206_p6 }
  0x14   :  { %p1209_p9 = pnand %p1208_p8, %p1202_p5 }
  0x16   :  { %1212 = shalt.err (!%p1209_p9)
}
  0x17   :  { %36 = dma.hbm_to_vmem [thread:$0]  %s1664_s2, 16, %s34_s27, [#allocation6]  }
  0x18   :  { %1233 = dma.done.wait [#allocation3], 16  }
  0x19   :  { %1234 = vsyncadd [#allocation3], 4294967280 }
  0x1a   :  { %1235 = dma.done.wait [#allocation6], 16  }
  0x1b   :  { %1236 = vsyncadd [#allocation6], 4294967280  ;;  %v1241_v0 = vmov 0.0   ;;  %v1309_v1 = vld [vmem:[%s1662_s0] sm:$0xff]  ;;  %s1242_s14 = smov 118   ;;  %s1243_s15 = smov 116  }
  0x1c   :  { %963 = vmatprep.subr.mxu0 %v1241_v0  ;;  %992 = vmatprep.subr.mxu1 %v1241_v0  ;;  %s1244_s2 = smov 119   ;;  %s1245_s16 = smov 117   ;;  %vm1252_vm0 = vmmov 0   ;;  %v91_v2 = vld [vmem:[%s1666_s4] sm:$0xff]  ;;  %v1255_v3 = vmov 0   ;;  %vm97_vm1 = vcmask 850944  }
  0x1d   :  { %81 = vrot.lane.b32.xlu1 %v1309_v1, %s1242_s14  ;;  %87 = vrot.lane.b32.xlu0 %v1309_v1, %s1243_s15  ;;  %s1246_s17 = smov 121   ;;  %s1247_s18 = smov 120   ;;  %v90_v15 = vld [vmem:[%s1665_s3] sm:$0xff]  ;;  %v1429_v54 = vand.u32 4294901760, %v1309_v1  ;;  %vm738_vm2 = vcmask 15360   ;;  %vm740_vm3 = vcmask 556032  }
  0x1e   :  { %s1248_s0 = smov 123   ;;  %s1249_s19 = smov 122   ;;  %989 = vmatprep.mubr.msk.f32.mxu0 %vm1252_vm0, %v1241_v0  ;;  %1018 = vmatprep.mubr.msk.f32.mxu1 %vm1252_vm0, %v1241_v0  ;;  %v99_v22 = vsel %vm97_vm1, %v90_v15, 0  ;;  %vm781_vm4 = vcmask 1043456   ;;  %vm805_vm5 = vcmask 588800   ;;  %vm852_vm6 = vcmask 539648  }
  0x1f   :  { %s1250_s20 = smov 125   ;;  %s1251_s21 = smov 124   ;;  %1170 = vset.pattern.permute.xlu0 %v1255_v3  ;;  %v1384_v31 = vand.u32 4294901760, %v99_v22 }
  0x20   :  { %s1253_s22 = smov 127   ;;  %s1254_s23 = smov 126  }
  0x21   :  { %78 = vrot.lane.b32.xlu1 %v1309_v1, %s1244_s2  ;;  %84 = vrot.lane.b32.xlu0 %v1309_v1, %s1245_s16  ;;  %v1410_v43 = vsub.f32 %v99_v22, %v1384_v31  ;;  %s1256_s3 = smov 2   ;;  %s1257_s30 = smov [#allocation7]  }
  0x22   :  { %s860_s8 = sshll.u32 %s1257_s30, 4  ;;  %s861_s8 = int_to_ptr.vmem [resolvable:$true] %s860_s8 }
  0x23   :  { %v181_v57 = vand.u32 4294901760, %v1410_v43  ;;  %s1213_s9 = scalar_lea.vmem %s861_s8, 128  ;;  %p1218_p11 = scmp.lt.s32.totalorder %s861_s8, %s861_s8 }
  0x24   :  { %p1214_p10 = scmp.ne.s32.totalorder %s861_s8, %s1213_s9  ;;  %p1219_p12 = scmp.lt.s32.totalorder %s1213_s9, %s1213_s9 }
  0x25   :  { %72 = vrot.lane.b32.xlu1 %v1309_v1, %s1246_s17  ;;  %75 = vrot.lane.b32.xlu0 %v1309_v1, %s1247_s18 }
  0x26   :  { %p1220_p13 = por %p1219_p12, %p1218_p11 }
  0x28   :  { %p1221_p0 = pnand %p1220_p13, %p1214_p10 }
  0x29   :  { %66 = vrot.lane.b32.xlu1 %v1309_v1, %s1248_s0  ;;  %69 = vrot.lane.b32.xlu0 %v1309_v1, %s1249_s19 }
  0x2d   :  { %60 = vrot.lane.b32.xlu1 %v1309_v1, %s1250_s20  ;;  %63 = vrot.lane.b32.xlu0 %v1309_v1, %s1251_s21 }
  0x31   :  { %54 = vrot.lane.b32.xlu1 %v1309_v1, %s1253_s22  ;;  %57 = vrot.lane.b32.xlu0 %v1309_v1, %s1254_s23 }
  0x35   :  { %94 = vperm.xlu0 %1170, %v91_v2  }
  0x8f   :  { %v82_v4 = vpop.permute.xlu1 %81  ;;  %v88_v5 = vpop.permute.xlu0 %87 }
  0x90   :  { %v1334_v6 = vand.u32 4294901760, %v82_v4  ;;  %v1336_v7 = vand.u32 4294901760, %v88_v5 }
  0x92   :  { %v1339_v8 = vsub.f32 %v88_v5, %v1336_v7  ;;  %964 = vmatpush3.msra.mxu0 %v1336_v7  ;;  %v1343_v9 = vsub.f32 %v82_v4, %v1334_v6 }
  0x93   :  { %v79_v10 = vpop.permute.xlu1 %78  ;;  %v85_v11 = vpop.permute.xlu0 %84  ;;  %965 = vmatprep.subr.mxu0 %v1241_v0 }
  0x94   :  { %v1346_v12 = vand.u32 4294901760, %v79_v10  ;;  %v1348_v13 = vand.u32 4294901760, %v85_v11  ;;  %v198_v14 = vand.u32 4294901760, %v1339_v8  ;;  %v212_v19 = vand.u32 4294901760, %v1343_v9 }
  0x96   :  { %v1355_v16 = vsub.f32 %v79_v10, %v1346_v12  ;;  %v1358_v17 = vsub.f32 %v85_v11, %v1348_v13  ;;  %966 = vmatpush3.msra.mxu0 %v1348_v13  ;;  %v199_v18 = vsub.f32 %v1339_v8, %v198_v14  ;;  %v213_v34 = vsub.f32 %v1343_v9, %v212_v19 }
  0x97   :  { %v73_v20 = vpop.permute.xlu1 %72  ;;  %967 = vmatprep.subr.mxu0 %v1241_v0  ;;  %v76_v21 = vpop.permute.xlu0 %75  ;;  %v1458_v10 = vsub.f32 %v1309_v1, %v1429_v54 }
  0x98   :  { %v205_v23 = vand.u32 4294901760, %v1358_v17  ;;  %v1367_v24 = vand.u32 4294901760, %v73_v20  ;;  %v1369_v25 = vand.u32 4294901760, %v76_v21  ;;  %968 = vmatpush3.msra.mxu0 %v1334_v6  ;;  %v219_v26 = vand.u32 4294901760, %v1355_v16 }
  0x99   :  { %969 = vmatprep.subr.mxu0 %v1241_v0  ;;  %v200_v27 = vand.u32 4294901760, %v199_v18  ;;  %v214_v46 = vand.u32 4294901760, %v213_v34  ;;  %v182_v18 = vsub.f32 %v1410_v43, %v181_v57 }
  0x9a   :  { %v1375_v28 = vsub.f32 %v73_v20, %v1367_v24  ;;  %v1378_v29 = vsub.f32 %v76_v21, %v1369_v25  ;;  %970 = vmatpush3.msra.mxu0 %v1346_v12  ;;  %v206_v30 = vsub.f32 %v1358_v17, %v205_v23  ;;  %v220_v40 = vsub.f32 %v1355_v16, %v219_v26 }
  0x9b   :  { %993 = vmatpush3.msra.mxu1 %v200_v27  ;;  %v67_v32 = vpop.permute.xlu1 %66  ;;  %971 = vmatprep.subr.mxu0 %v1241_v0  ;;  %v70_v33 = vpop.permute.xlu0 %69 }
  0x9c   :  { %v226_v35 = vand.u32 4294901760, %v1378_v29  ;;  %v1391_v36 = vand.u32 4294901760, %v67_v32  ;;  %v1393_v37 = vand.u32 4294901760, %v70_v33  ;;  %972 = vmatpush3.msra.mxu0 %v1369_v25  ;;  %994 = vmatprep.subr.mxu1 %v1241_v0  ;;  %v233_v38 = vand.u32 4294901760, %v1375_v28 }
  0x9d   :  { %973 = vmatprep.subr.mxu0 %v1241_v0  ;;  %v207_v39 = vand.u32 4294901760, %v206_v30  ;;  %v221_v52 = vand.u32 4294901760, %v220_v40 }
  0x9e   :  { %v1403_v41 = vsub.f32 %v67_v32, %v1391_v36  ;;  %v1406_v42 = vsub.f32 %v70_v33, %v1393_v37  ;;  %974 = vmatpush3.msra.mxu0 %v1367_v24  ;;  %v227_v47 = vsub.f32 %v1378_v29, %v226_v35  ;;  %v234_v53 = vsub.f32 %v1375_v28, %v233_v38 }
  0x9f   :  { %995 = vmatpush3.msra.mxu1 %v207_v39  ;;  %v61_v44 = vpop.permute.xlu1 %60  ;;  %975 = vmatprep.subr.mxu0 %v1241_v0  ;;  %v64_v45 = vpop.permute.xlu0 %63  ;;  %v282_v32 = vand.u32 4294901760, %v1458_v10  ;;  %v183_v33 = vand.u32 4294901760, %v182_v18 }
  0xa0   :  { %v240_v48 = vand.u32 4294901760, %v1406_v42  ;;  %v1417_v49 = vand.u32 4294901760, %v61_v44  ;;  %996 = vmatprep.subr.mxu1 %v1241_v0  ;;  %v1420_v50 = vand.u32 4294901760, %v64_v45  ;;  %976 = vmatpush3.msra.mxu0 %v1393_v37  ;;  %v247_v51 = vand.u32 4294901760, %v1403_v41 }
  0xa1   :  { %997 = vmatpush3.msra.mxu1 %v214_v46  ;;  %977 = vmatprep.subr.mxu0 %v1241_v0  ;;  %v228_v60 = vand.u32 4294901760, %v227_v47  ;;  %v235_v4 = vand.u32 4294901760, %v234_v53 }
  0xa2   :  { %v1432_v55 = vsub.f32 %v61_v44, %v1417_v49  ;;  %v1435_v56 = vsub.f32 %v64_v45, %v1420_v50  ;;  %998 = vmatprep.subr.mxu1 %v1241_v0  ;;  %978 = vmatpush3.msra.mxu0 %v1391_v36  ;;  %v241_v61 = vsub.f32 %v1406_v42, %v240_v48 }
  0xa3   :  { %999 = vmatpush3.msra.mxu1 %v221_v52  ;;  %v55_v58 = vpop.permute.xlu1 %54  ;;  %979 = vmatprep.subr.mxu0 %v1241_v0  ;;  %v58_v59 = vpop.permute.xlu0 %57  ;;  %v248_v5 = vsub.f32 %v1403_v41, %v247_v51  ;;  %v283_v45 = vsub.f32 %v1458_v10, %v282_v32 }
  0xa4   :  { %v254_v62 = vand.u32 4294901760, %v1435_v56  ;;  %v1445_v63 = vand.u32 4294901760, %v55_v58  ;;  %1000 = vmatprep.subr.mxu1 %v1241_v0  ;;  %v1448_v2 = vand.u32 4294901760, %v58_v59  ;;  %980 = vmatpush3.msra.mxu0 %v1420_v50  ;;  %v261_v3 = vand.u32 4294901760, %v1432_v55 }
  0xa5   :  { %1001 = vmatpush3.msra.mxu1 %v228_v60  ;;  %981 = vmatprep.subr.mxu0 %v1241_v0  ;;  %v242_v20 = vand.u32 4294901760, %v241_v61  ;;  %v249_v27 = vand.u32 4294901760, %v248_v5  ;;  %v284_v52 = vand.u32 4294901760, %v283_v45  ;;  %v871_v60 = vld [vmem:[#allocation5] ss:$0 sm:$0xff] }
  0xa6   :  { %v1461_v11 = vsub.f32 %v55_v58, %v1445_v63  ;;  %v1464_v15 = vsub.f32 %v58_v59, %v1448_v2  ;;  %1002 = vmatprep.subr.mxu1 %v1241_v0  ;;  %982 = vmatpush3.msra.mxu0 %v1417_v49  ;;  %v255_v1 = vsub.f32 %v1435_v56, %v254_v62  ;;  %v870_v5 = vld [vmem:[#allocation2] ss:$0 sm:$0xff] }
  0xa7   :  { %1003 = vmatpush3.msra.mxu1 %v235_v4  ;;  %983 = vmatprep.subr.mxu0 %v1241_v0  ;;  %v262_v30 = vsub.f32 %v1432_v55, %v261_v3 }
  0xa8   :  { %v268_v21 = vand.u32 4294901760, %v1464_v15  ;;  %1004 = vmatprep.subr.mxu1 %v1241_v0  ;;  %984 = vmatpush3.msra.mxu0 %v1448_v2  ;;  %v275_v22 = vand.u32 4294901760, %v1461_v11  ;;  %v256_v34 = vand.u32 4294901760, %v255_v1 }
  0xa9   :  { %1005 = vmatpush3.msra.mxu1 %v242_v20  ;;  %985 = vmatprep.subr.mxu0 %v1241_v0  ;;  %v263_v40 = vand.u32 4294901760, %v262_v30 }
  0xaa   :  { %1006 = vmatprep.subr.mxu1 %v1241_v0  ;;  %986 = vmatpush3.msra.mxu0 %v1445_v63  ;;  %v269_v39 = vsub.f32 %v1464_v15, %v268_v21  ;;  %v276_v44 = vsub.f32 %v1461_v11, %v275_v22 }
  0xab   :  { %1007 = vmatpush3.msra.mxu1 %v249_v27  ;;  %987 = vmatprep.subr.mxu0 %v1241_v0 }
  0xac   :  { %1008 = vmatprep.subr.mxu1 %v1241_v0  ;;  %988 = vmatpush3.msra.mxu0 %v1429_v54  ;;  %v270_v46 = vand.u32 4294901760, %v269_v39  ;;  %v277_v47 = vand.u32 4294901760, %v276_v44  ;;  %v799_v44 = vld [vmem:[%s1668_s6] sm:$0xff] }
  0xad   :  { %1009 = vmatpush3.msra.mxu1 %v256_v34  ;;  %1021 = vmatprep.subr.mxu0 %v1241_v0 }
  0xae   :  { %1010 = vmatprep.subr.mxu1 %v1241_v0  ;;  %990 = vmatmul.mubr.f32.vlgmr.msra.gmra.mxu0 %v183_v33 }
  0xaf   :  { %1011 = vmatpush3.msra.mxu1 %v263_v40  ;;  %1022 = vmatpush3.msra.mxu0 %v1339_v8 }
  0xb0   :  { %1012 = vmatprep.subr.mxu1 %v1241_v0  ;;  %1023 = vmatprep.subr.mxu0 %v1241_v0 }
  0xb1   :  { %1013 = vmatpush3.msra.mxu1 %v270_v46  ;;  %1024 = vmatpush3.msra.mxu0 %v1358_v17  ;;  %v95_v17 = vpop.permute.xlu0 %94 }
  0xb2   :  { %1014 = vmatprep.subr.mxu1 %v1241_v0  ;;  %1025 = vmatprep.subr.mxu0 %v1241_v0 }
  0xb3   :  { %1015 = vmatpush3.msra.mxu1 %v277_v47  ;;  %1026 = vmatpush3.msra.mxu0 %v1343_v9 }
  0xb4   :  { %1016 = vmatprep.subr.mxu1 %v1241_v0  ;;  %1027 = vmatprep.subr.mxu0 %v1241_v0 }
  0xb5   :  { %1017 = vmatpush3.msra.mxu1 %v284_v52  ;;  %1028 = vmatpush3.msra.mxu0 %v1355_v16 }
  0xb6   :  { %1019 = vmatmul.mubr.f32.vlgmr.msra.gmra.mxu1 %v1384_v31  ;;  %1029 = vmatprep.subr.mxu0 %v1241_v0 }
  0xb7   :  { %1050 = vmatprep.subr.mxu1 %v1241_v0  ;;  %1030 = vmatpush3.msra.mxu0 %v1378_v29 }
  0xb8   :  { %1051 = vmatpush3.msra.mxu1 %v1336_v7  ;;  %1031 = vmatprep.subr.mxu0 %v1241_v0 }
  0xb9   :  { %1052 = vmatprep.subr.mxu1 %v1241_v0  ;;  %1032 = vmatpush3.msra.mxu0 %v1375_v28 }
  0xba   :  { %1053 = vmatpush3.msra.mxu1 %v1348_v13  ;;  %1033 = vmatprep.subr.mxu0 %v1241_v0 }
  0xbb   :  { %1054 = vmatprep.subr.mxu1 %v1241_v0  ;;  %1034 = vmatpush3.msra.mxu0 %v1406_v42 }
  0xbc   :  { %1055 = vmatpush3.msra.mxu1 %v1334_v6  ;;  %1035 = vmatprep.subr.mxu0 %v1241_v0 }
  0xbd   :  { %1056 = vmatprep.subr.mxu1 %v1241_v0  ;;  %1036 = vmatpush3.msra.mxu0 %v1403_v41 }
  0xbe   :  { %1057 = vmatpush3.msra.mxu1 %v1346_v12  ;;  %1037 = vmatprep.subr.mxu0 %v1241_v0 }
  0xbf   :  { %1058 = vmatprep.subr.mxu1 %v1241_v0  ;;  %1038 = vmatpush3.msra.mxu0 %v1435_v56 }
  0xc0   :  { %1059 = vmatpush3.msra.mxu1 %v1369_v25  ;;  %1039 = vmatprep.subr.mxu0 %v1241_v0 }
  0xc1   :  { %1060 = vmatprep.subr.mxu1 %v1241_v0  ;;  %1040 = vmatpush3.msra.mxu0 %v1432_v55 }
  0xc2   :  { %1061 = vmatpush3.msra.mxu1 %v1367_v24  ;;  %1041 = vmatprep.subr.mxu0 %v1241_v0 }
  0xc3   :  { %1062 = vmatprep.subr.mxu1 %v1241_v0  ;;  %1042 = vmatpush3.msra.mxu0 %v1464_v15 }
  0xc4   :  { %1063 = vmatpush3.msra.mxu1 %v1393_v37  ;;  %1043 = vmatprep.subr.mxu0 %v1241_v0 }
  0xc5   :  { %1064 = vmatprep.subr.mxu1 %v1241_v0  ;;  %1044 = vmatpush3.msra.mxu0 %v1461_v11 }
  0xc6   :  { %1065 = vmatpush3.msra.mxu1 %v1391_v36  ;;  %1045 = vmatprep.subr.mxu0 %v1241_v0 }
  0xc7   :  { %1066 = vmatprep.subr.mxu1 %v1241_v0  ;;  %1046 = vmatpush3.msra.mxu0 %v1458_v10 }
  0xc8   :  { %1047 = vmatprep.mubr.msk.f32.mxu0 %vm1252_vm0, %v1241_v0  ;;  %1067 = vmatpush3.msra.mxu1 %v1420_v50 }
  0xc9   :  { %1048 = vmatmul.mubr.f32.vlgmr.msra.gmra.mxu0 %v1410_v43  ;;  %1068 = vmatprep.subr.mxu1 %v1241_v0 }
  0xca   :  { %1079 = vmatprep.subr.mxu0 %v1241_v0  ;;  %1069 = vmatpush3.msra.mxu1 %v1417_v49 }
  0xcb   :  { %1080 = vmatpush3.msra.mxu0 %v198_v14  ;;  %1070 = vmatprep.subr.mxu1 %v1241_v0 }
  0xcc   :  { %1081 = vmatprep.subr.mxu0 %v1241_v0  ;;  %1071 = vmatpush3.msra.mxu1 %v1448_v2 }
  0xcd   :  { %1082 = vmatpush3.msra.mxu0 %v205_v23  ;;  %1072 = vmatprep.subr.mxu1 %v1241_v0 }
  0xce   :  { %1083 = vmatprep.subr.mxu0 %v1241_v0  ;;  %1073 = vmatpush3.msra.mxu1 %v1445_v63 }
  0xcf   :  { %1084 = vmatpush3.msra.mxu0 %v212_v19  ;;  %1074 = vmatprep.subr.mxu1 %v1241_v0 }
  0xd0   :  { %1085 = vmatprep.subr.mxu0 %v1241_v0  ;;  %1075 = vmatpush3.msra.mxu1 %v1429_v54 }
  0xd1   :  { %1076 = vmatprep.mubr.msk.f32.mxu1 %vm1252_vm0, %v1241_v0  ;;  %1086 = vmatpush3.msra.mxu0 %v219_v26 }
  0xd2   :  { %1077 = vmatmul.mubr.f32.vlgmr.msra.gmra.mxu1 %v181_v57  ;;  %1087 = vmatprep.subr.mxu0 %v1241_v0 }
  0xd3   :  { %1108 = vmatprep.subr.mxu1 %v1241_v0  ;;  %1088 = vmatpush3.msra.mxu0 %v226_v35 }
  0xd4   :  { %1109 = vmatpush3.msra.mxu1 %v1336_v7  ;;  %1089 = vmatprep.subr.mxu0 %v1241_v0 }
  0xd5   :  { %1110 = vmatprep.subr.mxu1 %v1241_v0  ;;  %1090 = vmatpush3.msra.mxu0 %v233_v38 }
  0xd6   :  { %1111 = vmatpush3.msra.mxu1 %v1348_v13  ;;  %1091 = vmatprep.subr.mxu0 %v1241_v0 }
  0xd7   :  { %1112 = vmatprep.subr.mxu1 %v1241_v0  ;;  %1092 = vmatpush3.msra.mxu0 %v240_v48 }
  0xd8   :  { %1113 = vmatpush3.msra.mxu1 %v1334_v6  ;;  %1093 = vmatprep.subr.mxu0 %v1241_v0 }
  0xd9   :  { %1114 = vmatprep.subr.mxu1 %v1241_v0  ;;  %1094 = vmatpush3.msra.mxu0 %v247_v51 }
  0xda   :  { %1115 = vmatpush3.msra.mxu1 %v1346_v12  ;;  %1095 = vmatprep.subr.mxu0 %v1241_v0 }
  0xdb   :  { %1116 = vmatprep.subr.mxu1 %v1241_v0  ;;  %1096 = vmatpush3.msra.mxu0 %v254_v62 }
  0xdc   :  { %1117 = vmatpush3.msra.mxu1 %v1369_v25  ;;  %1097 = vmatprep.subr.mxu0 %v1241_v0 }
  0xdd   :  { %1118 = vmatprep.subr.mxu1 %v1241_v0  ;;  %1098 = vmatpush3.msra.mxu0 %v261_v3 }
  0xde   :  { %1119 = vmatpush3.msra.mxu1 %v1367_v24  ;;  %1099 = vmatprep.subr.mxu0 %v1241_v0 }
  0xdf   :  { %1120 = vmatprep.subr.mxu1 %v1241_v0  ;;  %1100 = vmatpush3.msra.mxu0 %v268_v21 }
  0xe0   :  { %1121 = vmatpush3.msra.mxu1 %v1393_v37  ;;  %1101 = vmatprep.subr.mxu0 %v1241_v0 }
  0xe1   :  { %1122 = vmatprep.subr.mxu1 %v1241_v0  ;;  %1102 = vmatpush3.msra.mxu0 %v275_v22 }
  0xe2   :  { %1123 = vmatpush3.msra.mxu1 %v1391_v36  ;;  %1103 = vmatprep.subr.mxu0 %v1241_v0 }
  0xe3   :  { %1124 = vmatprep.subr.mxu1 %v1241_v0  ;;  %1104 = vmatpush3.msra.mxu0 %v282_v32 }
  0xe4   :  { %1105 = vmatprep.mubr.msk.f32.mxu0 %vm1252_vm0, %v1241_v0  ;;  %1125 = vmatpush3.msra.mxu1 %v1420_v50 }
  0xe5   :  { %1106 = vmatmul.mubr.f32.vlgmr.msra.gmra.mxu0 %v1384_v31  ;;  %1126 = vmatprep.subr.mxu1 %v1241_v0 }
  0xe6   :  { %1127 = vmatpush3.msra.mxu1 %v1417_v49  ;;  %1134 = vmatprep.mubr.msk.f32.mxu1 %vm1252_vm0, %v1241_v0 }
  0xe7   :  { %1128 = vmatprep.subr.mxu1 %v1241_v0  ;;  %1137 = vmatprep.subr.bf16.mxu0 %v1241_v0 }
  0xe8   :  { %1129 = vmatpush3.msra.mxu1 %v1448_v2  ;;  %1147 = vmatprep.mubr.msk.bf16.mxu0 %vm1252_vm0, %v1241_v0 }
  0xe9   :  { %1130 = vmatprep.subr.mxu1 %v1241_v0  ;;  %753 = vrot.lane.b32.xlu0 %v871_v60, %s1256_s3 }
  0xea   :  { %1131 = vmatpush3.msra.mxu1 %v1445_v63 }
  0xeb   :  { %1132 = vmatprep.subr.mxu1 %v1241_v0 }
  0xec   :  { %1133 = vmatpush3.msra.mxu1 %v1429_v54 }
  0xed   :  { %1135 = vmatmul.mubr.f32.vlgmr.msra.gmra.mxu1 %v1384_v31 }
 0x15b   :  { %v754_v21 = vpop.permute.xlu0 %753 }
 0x16e   :  { %v185_v6 = vpop.f32.mrf.mxu0 }
 0x16f   :  { %v186_v19 = vadd.f32 %v185_v6, %v95_v17  ;;  %v798_v17 = vld [vmem:[%s1667_s5] sm:$0xf] }
 0x170   :  { %v991_v7 = vpop.f32.mrf.mxu0 }
 0x176   :  { %v321_v8 = vpop.f32.mrf.mxu1 }
 0x177   :  { %v322_v24 = vadd.f32 %v321_v8, %v186_v19 }
 0x178   :  { %v1020_v9 = vpop.f32.mrf.mxu1 }
 0x189   :  { %v419_v12 = vpop.f32.mrf.mxu0 }
 0x18a   :  { %v420_v26 = vadd.f32 %v419_v12, %v322_v24 }
 0x18b   :  { %v1049_v13 = vpop.f32.mrf.mxu0 }
 0x192   :  { %v505_v14 = vpop.f32.mrf.mxu1 }
 0x193   :  { %v506_v28 = vadd.f32 %v505_v14, %v420_v26 }
 0x194   :  { %v1078_v16 = vpop.f32.mrf.mxu1 }
 0x1a5   :  { %v615_v23 = vpop.f32.mrf.mxu0 }
 0x1a6   :  { %v616_v29 = vadd.f32 %v615_v23, %v506_v28 }
 0x1a7   :  { %v1107_v25 = vpop.f32.mrf.mxu0 }
 0x1ad   :  { %v699_v35 = vpop.f32.mrf.mxu1 }
 0x1ae   :  { %v700_v36 = vadd.f32 %v699_v35, %v616_v29 }
 0x1af   :  { %v1136_v37 = vpop.f32.mrf.mxu1 }
 0x1b0   :  { %v703_v31 = vand.u32 2147483647, %v700_v36 }
 0x1b2   :  { %v704_v38 = vmul.f32 -0.30864197, %v703_v31 }
 0x1b4   :  { %v705_v41 = vmul.f32 1.442695, %v704_v38 }
 0x1b6   :  { %1171 = vpow2.f32 %v705_v41 }
 0x1c3   :  { %v1172_v42 = vpop.eup %1171 }
 0x1c4   :  { %v707_v43 = vmul.f32 %v1172_v42, %v1172_v42  ;;  %v717_v55 = vmul.f32 0.8496076, %v1172_v42 }
 0x1c6   :  { %v708_v48 = vmul.f32 %v707_v43, %v707_v43 }
 0x1c8   :  { %v709_v49 = vmul.f32 %v708_v48, %v708_v48 }
 0x1ca   :  { %v710_v50 = vmul.f32 %v709_v49, %v709_v49  ;;  %v712_v51 = vmul.f32 %v1172_v42, %v709_v49 }
 0x1cc   :  { %v711_v53 = vmul.f32 %v710_v50, %v710_v50  ;;  %v713_v54 = vmul.f32 %v712_v51, %v710_v50  ;;  %v718_v56 = vmul.f32 -0.09572355, %v712_v51 }
 0x1ce   :  { %v714_v57 = vmul.f32 %v711_v53, %v710_v50  ;;  %v719_v58 = vadd.f32 %v718_v56, %v717_v55  ;;  %v720_v59 = vmul.f32 -0.9345461, %v713_v54 }
 0x1d0   :  { %v715_v61 = vmul.f32 %v1172_v42, %v714_v57  ;;  %v721_v63 = vadd.f32 %v720_v59, %v719_v58 }
 0x1d2   :  { %v716_v62 = vmul.f32 %v715_v61, %v711_v53  ;;  %v722_v2 = vmul.f32 -0.7335292, %v715_v61 }
 0x1d4   :  { %v723_v3 = vadd.f32 %v722_v2, %v721_v63  ;;  %v724_v4 = vmul.f32 0.2836622, %v716_v62 }
 0x1d6   :  { %v725_v10 = vadd.f32 %v724_v4, %v723_v3 }
 0x1d8   :  { %v733_v11 = vmul.f32 %v870_v5, %v725_v10 }
 0x1da   :  { %735 = vrot.lane.b32.xlu1 %v733_v11, %s1256_s3 }
 0x24c   :  { %v736_v15 = vpop.permute.xlu1 %735 }
 0x24d   :  { %v739_v18 = vsel %vm738_vm2, 0.0, %v736_v15 }
 0x24e   :  { %v741_v20 = vsel %vm740_vm3, %v739_v18, 0.0 }
 0x24f   :  { %743 = vrot.lane.b32.xlu1 %v741_v20, %s1253_s22  ;;  %v757_v34 = vpack.c.bf16 %v741_v20, %v741_v20 }
 0x251   :  { %v764_v40 = vrot.slane %v757_v34, 4 }
 0x2c1   :  { %v744_v1 = vpop.permute.xlu1 %743 }
 0x2c2   :  { %v746_v22 = vadd.f32 %v744_v1, %v741_v20 }
 0x2c4   :  { %v756_v27 = vmul.f32 %v754_v21, %v746_v22 }
 0x2c6   :  { %v758_v30 = vpack.c.bf16 %v756_v27, %v756_v27 }
 0x2c8   :  { %v761_v32 = vsel %vm738_vm2, 0, %v758_v30 }
 0x2c9   :  { %v762_v33 = vsel %vm740_vm3, %v761_v32, 0 }
 0x2ca   :  { %775 = vrot.lane.b32.xlu0 %v762_v33, %s1253_s22  ;;  %779 = vrot.lane.b32.xlu1 %v762_v33, %s1250_s20  ;;  %v774_v39 = vrot.slane %v762_v33, 4 }
 0x2ce   :  { %777 = vrot.lane.b32.xlu1 %v774_v39, %s1254_s23  ;;  %771 = vrot.lane.b32.xlu0 %v757_v34, %s1251_s21 }
 0x2d2   :  { %767 = vrot.lane.b32.xlu1 %v757_v34, %s1254_s23  ;;  %769 = vrot.lane.b32.xlu0 %v764_v40, %s1250_s20 }
 0x2d6   :  { %765 = vrot.lane.b32.xlu1 %v764_v40, %s1253_s22  ;;  %802 = vperm.xlu0 %1170, %v799_v44  }
 0x33c   :  { %v776_v45 = vpop.permute.xlu0 %775  ;;  %v780_v46 = vpop.permute.xlu1 %779 }
 0x33d   :  { %v810_v47 = vsel %vm781_vm4, %v780_v46, 0 }
 0x33e   :  { %1138 = vmatpush3.bf16.msra.mxu0 %v810_v47 }
 0x33f   :  { %1139 = vmatprep.subr.bf16.mxu0 %v1241_v0 }
 0x340   :  { %v778_v52 = vpop.permute.xlu1 %777  ;;  %v772_v6 = vpop.permute.xlu0 %771 }
 0x341   :  { %v796_v7 = vsel %vm781_vm4, %v776_v45, %v778_v52  ;;  %v792_v9 = vsel %vm781_vm4, %v772_v6, %v774_v39 }
 0x342   :  { %1140 = vmatpush3.bf16.msra.mxu0 %v796_v7 }
 0x343   :  { %1141 = vmatprep.subr.bf16.mxu0 %v1241_v0 }
 0x344   :  { %v768_v8 = vpop.permute.xlu1 %767  ;;  %v770_v12 = vpop.permute.xlu0 %769 }
 0x345   :  { %v788_v13 = vsel %vm781_vm4, %v768_v8, %v770_v12 }
 0x346   :  { %1142 = vmatpush3.bf16.msra.mxu0 %v792_v9 }
 0x347   :  { %1143 = vmatprep.subr.bf16.mxu0 %v1241_v0 }
 0x348   :  { %v766_v14 = vpop.permute.xlu1 %765 }
 0x349   :  { %v784_v16 = vsel %vm781_vm4, %v757_v34, %v766_v14 }
 0x34a   :  { %1144 = vmatpush3.bf16.msra.mxu0 %v788_v13 }
 0x34b   :  { %1145 = vmatprep.subr.bf16.mxu0 %v1241_v0 }
 0x34e   :  { %1146 = vmatpush3.bf16.msra.mxu0 %v784_v16 }
 0x351   :  { %1148 = vmatmul.mubr.msk.bf16.vlgmr.msra.gmra.mxu0 %vm805_vm5, %v798_v17  ;;  %v803_v19 = vpop.permute.xlu0 %802 }
 0x411   :  { %v846_v23 = vpop.f32.mrf.mxu0 }
 0x412   :  { %v847_v24 = vadd.f32 %v846_v23, %v803_v19 }
 0x413   :  { %v1149_v25 = vpop.f32.mrf.mxu0 }
 0x414   :  { %853 = vst.msk [vmem:[#allocation7] sm:$0xff] %vm852_vm6, %v847_v24 }
 0x415   :  { %v849_v26 = vpop.f32.mrf.mxu0 }
 0x416   :  { %1224 = shalt.err (!%p1221_p0)
}
 0x417   :  { %863 = dma.vmem_to_hbm [thread:$0]  %s861_s8, 128, %s1669_s7, [#allocation4]   ;;  %v1150_v0 = vpop.f32.mrf.mxu0 }
 0x418   :  { %1237 = dma.done.wait [#allocation4], 128  }
 0x419   :  { %1238 = vsyncadd [#allocation4], 4294967168 }
 0x41a   :  { %867 = vsyncpa [#allocation3], 1 }
 0x41b   :  { %868 = vsyncpa [#allocation6], 1 }
 0x41c   :  { %869 = vsyncpa [#allocation4], 1 }

</bundles_post_ra>
